<compile_context>
chip_gen: v7x
topology: tpu7x:2x2x1
jax: 0.10.0
libtpu: 0.0.40
codegen_flags: <defaults>
</compile_context>

<pallas_src>
import functools

import numpy as np
import jax
import jax.numpy as jnp
from jax import lax
from jax.experimental import pallas as pl
from jax.experimental.pallas import tpu as pltpu


def _mm(a, b):
    """a @ b with f32 accumulation."""
    return jnp.dot(a, b, preferred_element_type=jnp.float32)


def _mm_nt(a, b):
    """a @ b.T (contract the last dims of both) with f32 accumulation."""
    return lax.dot_general(a, b, (((a.ndim - 1,), (b.ndim - 1,)), ((), ())),
                           preferred_element_type=jnp.float32)


def _blk(ref, r0, nr, c0, nc):
    """Static sub-block read of a packed weight slab."""
    return ref[pl.ds(r0, nr), pl.ds(c0, nc)]


def _shift_rows(x, k):
    """Rows shifted so row t holds x[t + k] (wrapped tail rows are garbage)."""
    if k == 0:
        return x
    return pltpu.roll(x, shift=x.shape[0] - k, axis=0)


# --------------------------------------------------------------------------
# Fused DUET kernel: one grid step = `bb` queries, each with its N docs.
# --------------------------------------------------------------------------
def _duet_kernel(rows_ref, xwide_ref, wb_ref, wf_ref, out_ref, *,
                 bb, Q, N, D, V, F, K, P):
    ND = N * D
    DV = D * V
    Tq = Q - K + 1
    seg = Q + ND

    rows = rows_ref[0]                       # (bb*seg, V)  bf16  [query; docs]
    xwide = xwide_ref[0]                     # (bb*N, D*V)  bf16  per-doc flat

    # ---- static slices of the packed weight slabs ----
    wl_exp = wb_ref[pl.ds(0, F), :]                      # (F, DV)   bf16
    tile = wb_ref[pl.ds(F, V), :]                        # (V, DV)   bf16
    wd_cat = _blk(wb_ref, F + V, K * F, 0, V)            # (K*F, V)  bf16
    w1 = _blk(wb_ref, F + V + K * F, 1, 0, Q)            # (1, Q)    bf16

    c_loc = _blk(wf_ref, 0, 1, 0, F)                     # bl*sum(w1) + b1
    b2_loc = _blk(wf_ref, 1, 1, 0, F)
    w3_loc = _blk(wf_ref, 2, 1, 0, F)
    bd = _blk(wf_ref, 3, 1, 0, F)
    b1q = _blk(wf_ref, 4, 1, 0, F)
    bdoc = _blk(wf_ref, 5, 1, 0, F)
    b3_dist = _blk(wf_ref, 6, 1, 0, F)
    w4 = _blk(wf_ref, 7, 1, 0, F)
    b3_loc = _blk(wf_ref, 8, 1, 0, 1)                    # scalars as (1,1)
    b2_dist = _blk(wf_ref, 8, 1, 1, 1)
    b4_dist = _blk(wf_ref, 8, 1, 2, 1)
    W2 = _blk(wf_ref, 16, F, 0, F)
    W1q = _blk(wf_ref, 16 + F, F, 0, F)
    Wdoc = _blk(wf_ref, 16 + 2 * F, F, 0, F)
    W3 = _blk(wf_ref, 16 + 3 * F, F, 0, F)
    S2 = _blk(wf_ref, 16 + 4 * F, N, 0, ND)              # per-doc fc2 weights

    # ---- distributed conv: one merged matmul over the whole [q; docs] slab ----
    conv_all = _mm_nt(rows, wd_cat)                      # (bb*seg, K*F) f32
    acc = conv_all[:, 0:F]
    for k in range(1, K):
        acc = acc + _shift_rows(conv_all[:, k * F:(k + 1) * F], k)
    # acc[t, f] = conv window starting at row t (valid only inside a segment)

    out_rows = []
    for b in range(bb):                                  # static unroll (bb small)
        off = b * seg

        # ---------------- local branch: one fused matmul ----------------
        qb = rows[off:off + Q, :]                        # (Q, V)  bf16
        qw = _mm(w1, qb)                                 # (1, V)  = w1 @ q
        qw_t = _mm(qw.astype(jnp.bfloat16), tile)        # (1, D*V) tiled qw
        xb = xwide[b * N:(b + 1) * N, :]                 # (N, D*V) bf16
        xw = xb * qw_t.astype(jnp.bfloat16)              # fold qw into the docs
        m1 = jnp.tanh(_mm_nt(xw, wl_exp) + c_loc)        # (N, F)  conv1d+fc1
        m2 = jnp.tanh(_mm_nt(m1, W2) + b2_loc)           # (N, F)  fc2
        loc_row = jnp.tanh(_mm_nt(w3_loc, m2) + b3_loc)  # (1, N)  fc3

        # ---------------- distributed branch ----------------
        q_conv = acc[off:off + Tq, :] + bd               # (Tq, F)
        qmax = jnp.max(q_conv, axis=0, keepdims=True)    # (1, F) global max-pool
        qrep = jnp.tanh(_mm_nt(qmax, W1q) + b1q)         # (1, F) fc1_query

        dconv = acc[off + Q:off + Q + ND, :] + bd        # (ND, F) doc conv rows
        pooled = dconv                                   # max_pool1d(P, stride 1)
        for s in range(1, P):
            pooled = jnp.maximum(pooled, _shift_rows(dconv, s))
        doc_rep = _mm_nt(pooled, Wdoc) + bdoc            # (ND, F) conv1d_doc
        sim = qrep * doc_rep                             # (ND, F) query-doc sim
        m = jnp.tanh(_mm(S2, sim) + b2_dist)             # (N, F)  fc2 (per doc,
                                                         #  garbage rows masked)
        m3 = jnp.tanh(_mm_nt(m, W3) + b3_dist)           # (N, F)  fc3
        dist_row = jnp.tanh(_mm_nt(w4, m3) + b4_dist)    # (1, N)  fc4

        # ---------------- combine + per-query log_softmax ----------------
        total = loc_row + dist_row                       # (1, N)
        z = total - jnp.max(total, axis=-1, keepdims=True)
        lse = jnp.log(jnp.sum(jnp.exp(z), axis=-1, keepdims=True))
        out_rows.append(z - lse)

    out_block = out_rows[0] if bb == 1 else jnp.concatenate(out_rows, axis=0)
    out_ref[0] = out_block


# --------------------------------------------------------------------------
# Host-side parameter packing (done ONCE, outside the per-call path).
# --------------------------------------------------------------------------
def pack_params(local_p, dist_p, *, N, D, V, Q, F, K, pool_size):
    Td = D - K + 1
    Ld = Td - pool_size + 1
    ND, DV = N * D, D * V

    def pad_to(a, width):
        return jnp.pad(a, ((0, 0), (0, width - a.shape[1])))

    # bf16 slab: data-facing matmul weights.
    wl_exp = jnp.repeat(local_p["Wl"], V, axis=1)             # (F, DV)
    tile = jnp.tile(jnp.eye(V, dtype=jnp.float32), (1, D))    # (V, DV)
    wd_cat = dist_p["Wd"].reshape(K * F, V)                   # (K*F, V)
    wb = jnp.concatenate(
        [pad_to(wl_exp, DV), pad_to(tile, DV), pad_to(wd_cat, DV),
         pad_to(local_p["w1"], DV)], axis=0).astype(jnp.bfloat16)

    # f32 slab: biases, row vectors, (F,F) tail weights, per-doc fc2 weights.
    WF = max(F, ND)
    c_loc = local_p["bl"] * jnp.sum(local_p["w1"]) + local_p["b1"][0, 0]
    scal = jnp.zeros((1, WF), jnp.float32)
    scal = scal.at[0, 0].set(local_p["b3"][0, 0])
    scal = scal.at[0, 1].set(dist_p["b2"][0, 0])
    scal = scal.at[0, 2].set(dist_p["b4"][0, 0])
    vec_rows = [c_loc, local_p["b2"], local_p["w3"], dist_p["bd"],
                dist_p["b1q"], dist_p["bdoc"], dist_p["b3"], dist_p["w4"]]
    vecs = jnp.concatenate(
        [pad_to(r, WF) for r in vec_rows] + [scal] +
        [jnp.zeros((16 - len(vec_rows) - 1, WF), jnp.float32)], axis=0)

    # S2[n, n*D + l] = w2[l] for l < Ld, zero elsewhere (masks the garbage rows
    # of the padded per-doc position grid).
    pos = jnp.arange(ND)
    w2pad = jnp.concatenate([dist_p["w2"][0], jnp.zeros((D - Ld,), jnp.float32)])
    vals = w2pad[pos % D]
    S2 = jnp.where((pos // D)[None, :] == jnp.arange(N)[:, None],
                   vals[None, :], 0.0)

    wf = jnp.concatenate(
        [vecs,
         pad_to(local_p["W2"], WF), pad_to(dist_p["W1q"], WF),
         pad_to(dist_p["Wdoc"], WF), pad_to(dist_p["W3"], WF),
         pad_to(S2, WF)], axis=0).astype(jnp.float32)
    return wb, wf


@functools.partial(jax.jit, static_argnames=("F", "K", "pool_size"))
def duet_forward(queries, docs, wb, wf, *, F, K, pool_size):
    B, Q, V = queries.shape
    _, N, D, _ = docs.shape
    seg = Q + N * D
    # Two fat steps on an even batch (one per TensorCore on v7x), else B steps.
    num_steps = 2 if (B % 2 == 0 and B >= 2) else B
    bb = B // num_steps

    rows_all = jnp.concatenate(
        [queries, docs.reshape(B, N * D, V)], axis=1
    ).reshape(num_steps, bb * seg, V).astype(jnp.bfloat16)
    xwide_all = docs.reshape(num_steps, bb * N, D * V).astype(jnp.bfloat16)

    kernel = functools.partial(_duet_kernel, bb=bb, Q=Q, N=N, D=D, V=V,
                               F=F, K=K, P=pool_size)
    grid_spec = pltpu.PrefetchScalarGridSpec(
        num_scalar_prefetch=0,
        grid=(num_steps,),
        in_specs=[
            pl.BlockSpec((1, bb * seg, V), lambda i: (i, 0, 0)),
            pl.BlockSpec((1, bb * N, D * V), lambda i: (i, 0, 0)),
            pl.BlockSpec(wb.shape, lambda i: (0, 0)),
            pl.BlockSpec(wf.shape, lambda i: (0, 0)),
        ],
        out_specs=pl.BlockSpec((1, bb, N), lambda i: (i, 0, 0)),
    )
    out = pl.pallas_call(
        kernel,
        grid_spec=grid_spec,
        out_shape=jax.ShapeDtypeStruct((num_steps, bb, N), jnp.float32),
        compiler_params=pltpu.CompilerParams(dimension_semantics=("parallel",)),
    )(rows_all, xwide_all, wb, wf)
    return out.reshape(B, N)


# --------------------------------------------------------------------------
# Deterministic synthetic parameters (shapes follow the torch __init__, stored
# in the orientation the kernel consumes).
# Note: torch hard-codes fc2 in-features as D - pool_size - 1, which equals the
# true pooled length (D - K + 1) - pool_size + 1 only when K == 3 (as here).
# --------------------------------------------------------------------------
def init_params(key, *, V, Q, D, F, K, pool_size):
    Ld = (D - K + 1) - pool_size + 1
    keys = jax.random.split(key, 20)
    n = lambda k, shape: jax.random.normal(k, shape, jnp.float32) * 0.1
    local = dict(
        Wl=n(keys[0], (F, D)), bl=n(keys[1], (1, F)),
        w1=n(keys[2], (1, Q)), b1=n(keys[3], (1, 1)),
        W2=n(keys[4], (F, F)), b2=n(keys[5], (1, F)),
        w3=n(keys[6], (1, F)), b3=n(keys[7], (1, 1)),
    )
    dist = dict(
        Wd=n(keys[8], (K, F, V)), bd=n(keys[9], (1, F)),
        W1q=n(keys[10], (F, F)), b1q=n(keys[11], (1, F)),
        Wdoc=n(keys[12], (F, F)), bdoc=n(keys[13], (1, F)),
        w2=n(keys[14], (1, Ld)), b2=n(keys[15], (1, 1)),
        W3=n(keys[16], (F, F)), b3=n(keys[17], (1, F)),
        w4=n(keys[18], (1, F)), b4=n(keys[19], (1, 1)),
    )
    return local, dist


# Pure-JAX f32 reference mirroring the torch forward (sanity check).
def duet_reference(queries, docs, lp, dp, *, pool_size):
    B, Q, V = queries.shape
    _, N, D, _ = docs.shape
    K = dp["Wd"].shape[0]
    BN = B * N
    # Local model
    q_exp = jnp.broadcast_to(queries[:, None], (B, N, Q, V)).reshape(BN, Q, V)
    clicks = docs.reshape(BN, D, V)
    inter = jnp.einsum("bqv,bdv->bqd", q_exp, clicks)
    conv = jnp.einsum("fd,bqd->bqf", lp["Wl"], inter) + lp["bl"]
    m1 = jnp.tanh(jnp.einsum("bqf,q->bf", conv, lp["w1"][0]) + lp["b1"][0, 0])
    m2 = jnp.tanh(m1 @ lp["W2"].T + lp["b2"])
    local_s = jnp.tanh(m2 @ lp["w3"][0] + lp["b3"][0, 0]).reshape(B, N)
    # Distributed model
    Tq, Td = Q - K + 1, D - K + 1
    convq = sum(jnp.einsum("btv,fv->btf", queries[:, k:k + Tq, :], dp["Wd"][k])
                for k in range(K)) + dp["bd"][None]
    qrep = jnp.tanh(convq.max(axis=1) @ dp["W1q"].T + dp["b1q"])
    convd = sum(jnp.einsum("btv,fv->btf", clicks[:, k:k + Td, :], dp["Wd"][k])
                for k in range(K)) + dp["bd"][None]
    Ld = Td - pool_size + 1
    pooled = convd[:, :Ld]
    for s in range(1, pool_size):
        pooled = jnp.maximum(pooled, convd[:, s:s + Ld])
    doc_rep = jnp.einsum("blg,fg->blf", pooled, dp["Wdoc"]) + dp["bdoc"][None]
    qrep_e = jnp.broadcast_to(qrep[:, None, None, :],
                              (B, N, Ld, qrep.shape[-1])).reshape(BN, Ld, -1)
    sim = qrep_e * doc_rep
    m = jnp.tanh(jnp.einsum("blf,l->bf", sim, dp["w2"][0]) + dp["b2"][0, 0])
    m3 = jnp.tanh(m @ dp["W3"].T + dp["b3"])
    dist_s = jnp.tanh(m3 @ dp["w4"][0] + dp["b4"][0, 0]).reshape(B, N)
    return jax.nn.log_softmax(local_s + dist_s, axis=1)


if __name__ == "__main__":
    # config: max_query_length=8, max_doc_length=16, vocab=16, nfilters=32,
    # dist_filter_size=3, local_filter_size=1, pool_size=4, dropout=eval identity.
    B, N, V, Q, D, F = 2, 4, 16, 8, 16, 32
    K, pool_size = 3, 4

    key = jax.random.PRNGKey(0)
    kq, kd, kp = jax.random.split(key, 3)
    batch_queries = jax.random.normal(kq, (B, Q, V), jnp.float32)
    batch_docs = jax.random.normal(kd, (B, N, D, V), jnp.float32)
    local_p, dist_p = init_params(kp, V=V, Q=Q, D=D, F=F, K=K, pool_size=pool_size)

    # Weight packing is hoisted out of the per-call path (done once).
    wb, wf = pack_params(local_p, dist_p, N=N, D=D, V=V, Q=Q, F=F, K=K,
                         pool_size=pool_size)

    out = duet_forward(batch_queries, batch_docs, wb, wf,
                       F=F, K=K, pool_size=pool_size)
    out = jax.block_until_ready(out)
    assert out.shape == (B, N)

    ref = duet_reference(batch_queries, batch_docs, local_p, dist_p,
                         pool_size=pool_size)
    # bf16 data-path operands -> slightly looser tolerance than pure-f32.
    np.testing.assert_allclose(np.asarray(out), np.asarray(ref),
                               rtol=4e-2, atol=4e-2)

    # TODO(synk): dropout is stochastic in train mode; implemented as eval-mode identity.
    print("KERNEL_OK")
</pallas_src>

<mosaic_0001>
module attributes {stable_mosaic.version = 11 : i64} {
  func.func @_duet_kernel(%arg0: i32, %arg1: memref<1x72x16xbf16, #tpu.memory_space<vmem>>, %arg2: memref<1x4x256xbf16, #tpu.memory_space<vmem>>, %arg3: memref<145x256xbf16, #tpu.memory_space<vmem>>, %arg4: memref<148x64xf32, #tpu.memory_space<vmem>>, %arg5: memref<1x1x4xf32, #tpu.memory_space<vmem>>) attributes {dimension_semantics = [#tpu.dimension_semantics<parallel>], iteration_bounds = array<i64: 2>, scalar_prefetch = 0 : i64, scratch_operands = 0 : i64, tpu.core_type = #tpu.core_type<tc>, window_params = [{transform_indices = @transform_0, window_bounds = array<i64: 1, 72, 16>}, {transform_indices = @transform_1, window_bounds = array<i64: 1, 4, 256>}, {pipeline_mode = #tpu.pipeline_mode<synchronous>, transform_indices = @transform_2, window_bounds = array<i64: 145, 256>}, {pipeline_mode = #tpu.pipeline_mode<synchronous>, transform_indices = @transform_3, window_bounds = array<i64: 148, 64>}, {transform_indices = @transform_4, window_bounds = array<i64: 1, 1, 4>}]} {
    %c0 = arith.constant 0 : index
    %c0_0 = arith.constant 0 : index
    %c0_1 = arith.constant 0 : index
    %0 = vector.load %arg1[%c0, %c0_0, %c0_1] : memref<1x72x16xbf16, #tpu.memory_space<vmem>>, vector<1x72x16xbf16>
    %1 = vector.shape_cast %0 : vector<1x72x16xbf16> to vector<72x16xbf16>
    %c0_2 = arith.constant 0 : index
    %c0_3 = arith.constant 0 : index
    %c0_4 = arith.constant 0 : index
    %2 = vector.load %arg2[%c0_2, %c0_3, %c0_4] : memref<1x4x256xbf16, #tpu.memory_space<vmem>>, vector<1x4x256xbf16>
    %3 = vector.shape_cast %2 : vector<1x4x256xbf16> to vector<4x256xbf16>
    %c0_5 = arith.constant 0 : index
    %c0_6 = arith.constant 0 : index
    %4 = vector.load %arg3[%c0_5, %c0_6] : memref<145x256xbf16, #tpu.memory_space<vmem>>, vector<32x256xbf16>
    %c32 = arith.constant 32 : index
    %c0_7 = arith.constant 0 : index
    %5 = vector.load %arg3[%c32, %c0_7] : memref<145x256xbf16, #tpu.memory_space<vmem>>, vector<16x256xbf16>
    %c48 = arith.constant 48 : index
    %c0_8 = arith.constant 0 : index
    %6 = vector.load %arg3[%c48, %c0_8] : memref<145x256xbf16, #tpu.memory_space<vmem>>, vector<96x16xbf16>
    %c144 = arith.constant 144 : index
    %c0_9 = arith.constant 0 : index
    %7 = vector.load %arg3[%c144, %c0_9] : memref<145x256xbf16, #tpu.memory_space<vmem>>, vector<1x8xbf16>
    %c0_10 = arith.constant 0 : index
    %c0_11 = arith.constant 0 : index
    %8 = vector.load %arg4[%c0_10, %c0_11] : memref<148x64xf32, #tpu.memory_space<vmem>>, vector<1x32xf32>
    %c1 = arith.constant 1 : index
    %c0_12 = arith.constant 0 : index
    %9 = vector.load %arg4[%c1, %c0_12] : memref<148x64xf32, #tpu.memory_space<vmem>>, vector<1x32xf32>
    %c2 = arith.constant 2 : index
    %c0_13 = arith.constant 0 : index
    %10 = vector.load %arg4[%c2, %c0_13] : memref<148x64xf32, #tpu.memory_space<vmem>>, vector<1x32xf32>
    %c3 = arith.constant 3 : index
    %c0_14 = arith.constant 0 : index
    %11 = vector.load %arg4[%c3, %c0_14] : memref<148x64xf32, #tpu.memory_space<vmem>>, vector<1x32xf32>
    %c4 = arith.constant 4 : index
    %c0_15 = arith.constant 0 : index
    %12 = vector.load %arg4[%c4, %c0_15] : memref<148x64xf32, #tpu.memory_space<vmem>>, vector<1x32xf32>
    %c5 = arith.constant 5 : index
    %c0_16 = arith.constant 0 : index
    %13 = vector.load %arg4[%c5, %c0_16] : memref<148x64xf32, #tpu.memory_space<vmem>>, vector<1x32xf32>
    %c6 = arith.constant 6 : index
    %c0_17 = arith.constant 0 : index
    %14 = vector.load %arg4[%c6, %c0_17] : memref<148x64xf32, #tpu.memory_space<vmem>>, vector<1x32xf32>
    %c7 = arith.constant 7 : index
    %c0_18 = arith.constant 0 : index
    %15 = vector.load %arg4[%c7, %c0_18] : memref<148x64xf32, #tpu.memory_space<vmem>>, vector<1x32xf32>
    %c8 = arith.constant 8 : index
    %c0_19 = arith.constant 0 : index
    %16 = vector.load %arg4[%c8, %c0_19] : memref<148x64xf32, #tpu.memory_space<vmem>>, vector<1x1xf32>
    %c8_20 = arith.constant 8 : index
    %c1_21 = arith.constant 1 : index
    %17 = vector.load %arg4[%c8_20, %c1_21] : memref<148x64xf32, #tpu.memory_space<vmem>>, vector<1x1xf32>
    %c8_22 = arith.constant 8 : index
    %c2_23 = arith.constant 2 : index
    %18 = vector.load %arg4[%c8_22, %c2_23] : memref<148x64xf32, #tpu.memory_space<vmem>>, vector<1x1xf32>
    %c16 = arith.constant 16 : index
    %c0_24 = arith.constant 0 : index
    %19 = vector.load %arg4[%c16, %c0_24] : memref<148x64xf32, #tpu.memory_space<vmem>>, vector<32x32xf32>
    %c48_25 = arith.constant 48 : index
    %c0_26 = arith.constant 0 : index
    %20 = vector.load %arg4[%c48_25, %c0_26] : memref<148x64xf32, #tpu.memory_space<vmem>>, vector<32x32xf32>
    %c80 = arith.constant 80 : index
    %c0_27 = arith.constant 0 : index
    %21 = vector.load %arg4[%c80, %c0_27] : memref<148x64xf32, #tpu.memory_space<vmem>>, vector<32x32xf32>
    %c112 = arith.constant 112 : index
    %c0_28 = arith.constant 0 : index
    %22 = vector.load %arg4[%c112, %c0_28] : memref<148x64xf32, #tpu.memory_space<vmem>>, vector<32x32xf32>
    %c144_29 = arith.constant 144 : index
    %c0_30 = arith.constant 0 : index
    %23 = vector.load %arg4[%c144_29, %c0_30] : memref<148x64xf32, #tpu.memory_space<vmem>>, vector<4x64xf32>
    %cst = arith.constant dense<0.000000e+00> : vector<72x96xf32>
    %24 = tpu.matmul %1, %6, %cst {dimension_numbers = #tpu.dot_dimension_numbers<[1], [1], [0], [0], [0, 0, 1, 0], [], []>} : vector<72x16xbf16>, vector<96x16xbf16>, vector<72x96xf32> -> vector<72x96xf32>
    %25 = vector.extract_strided_slice %24 {offsets = [0, 0], sizes = [72, 32], strides = [1, 1]} : vector<72x96xf32> to vector<72x32xf32>
    %26 = vector.extract_strided_slice %24 {offsets = [0, 32], sizes = [72, 32], strides = [1, 1]} : vector<72x96xf32> to vector<72x32xf32>
    %c71_i32 = arith.constant 71 : i32
    %27 = tpu.dynamic_rotate %26 by %c71_i32 dim 0 : vector<72x32xf32>, i32 -> vector<72x32xf32>
    %28 = arith.addf %25, %27 : vector<72x32xf32>
    %29 = vector.extract_strided_slice %24 {offsets = [0, 64], sizes = [72, 32], strides = [1, 1]} : vector<72x96xf32> to vector<72x32xf32>
    %c70_i32 = arith.constant 70 : i32
    %30 = tpu.dynamic_rotate %29 by %c70_i32 dim 0 : vector<72x32xf32>, i32 -> vector<72x32xf32>
    %31 = arith.addf %28, %30 : vector<72x32xf32>
    %32 = vector.extract_strided_slice %1 {offsets = [0, 0], sizes = [8, 16], strides = [1, 1]} : vector<72x16xbf16> to vector<8x16xbf16>
    %cst_31 = arith.constant dense<0.000000e+00> : vector<1x16xf32>
    %33 = tpu.matmul %7, %32, %cst_31 {dimension_numbers = #tpu.dot_dimension_numbers<[1], [0], [0], [1], [0, 0, 1, 1], [], []>} : vector<1x8xbf16>, vector<8x16xbf16>, vector<1x16xf32> -> vector<1x16xf32>
    %34 = arith.truncf %33 : vector<1x16xf32> to vector<1x16xbf16>
    %cst_32 = arith.constant dense<0.000000e+00> : vector<1x256xf32>
    %35 = tpu.matmul %34, %5, %cst_32 {dimension_numbers = #tpu.dot_dimension_numbers<[1], [0], [0], [1], [0, 0, 1, 1], [], []>} : vector<1x16xbf16>, vector<16x256xbf16>, vector<1x256xf32> -> vector<1x256xf32>
    %36 = arith.truncf %35 : vector<1x256xf32> to vector<1x256xbf16>
    %37 = vector.broadcast %36 : vector<1x256xbf16> to vector<4x256xbf16>
    %38 = arith.mulf %3, %37 : vector<4x256xbf16>
    %cst_33 = arith.constant dense<0.000000e+00> : vector<4x32xf32>
    %39 = tpu.matmul %38, %4, %cst_33 {dimension_numbers = #tpu.dot_dimension_numbers<[1], [1], [0], [0], [0, 0, 1, 0], [], []>} : vector<4x256xbf16>, vector<32x256xbf16>, vector<4x32xf32> -> vector<4x32xf32>
    %40 = vector.broadcast %8 : vector<1x32xf32> to vector<4x32xf32>
    %41 = arith.addf %39, %40 : vector<4x32xf32>
    %42 = math.tanh %41 : vector<4x32xf32>
    %cst_34 = arith.constant dense<0.000000e+00> : vector<4x32xf32>
    %43 = tpu.matmul %42, %19, %cst_34 {dimension_numbers = #tpu.dot_dimension_numbers<[1], [1], [0], [0], [0, 0, 1, 0], [], []>} : vector<4x32xf32>, vector<32x32xf32>, vector<4x32xf32> -> vector<4x32xf32>
    %44 = vector.broadcast %9 : vector<1x32xf32> to vector<4x32xf32>
    %45 = arith.addf %43, %44 : vector<4x32xf32>
    %46 = math.tanh %45 : vector<4x32xf32>
    %cst_35 = arith.constant dense<0.000000e+00> : vector<1x4xf32>
    %47 = tpu.matmul %10, %46, %cst_35 {dimension_numbers = #tpu.dot_dimension_numbers<[1], [1], [0], [0], [0, 0, 1, 0], [], []>} : vector<1x32xf32>, vector<4x32xf32>, vector<1x4xf32> -> vector<1x4xf32>
    %48 = vector.broadcast %16 : vector<1x1xf32> to vector<1x4xf32>
    %49 = arith.addf %47, %48 : vector<1x4xf32>
    %50 = math.tanh %49 : vector<1x4xf32>
    %51 = vector.extract_strided_slice %31 {offsets = [0, 0], sizes = [6, 32], strides = [1, 1]} : vector<72x32xf32> to vector<6x32xf32>
    %52 = vector.broadcast %11 : vector<1x32xf32> to vector<6x32xf32>
    %53 = arith.addf %51, %52 : vector<6x32xf32>
    %cst_36 = arith.constant dense<0xFF800000> : vector<32xf32>
    %54 = vector.multi_reduction <maximumf>, %53, %cst_36 [0] : vector<6x32xf32> to vector<32xf32>
    %55 = vector.shape_cast %54 : vector<32xf32> to vector<1x32xf32>
    %cst_37 = arith.constant dense<0.000000e+00> : vector<1x32xf32>
    %56 = tpu.matmul %55, %20, %cst_37 {dimension_numbers = #tpu.dot_dimension_numbers<[1], [1], [0], [0], [0, 0, 1, 0], [], []>} : vector<1x32xf32>, vector<32x32xf32>, vector<1x32xf32> -> vector<1x32xf32>
    %57 = arith.addf %56, %12 : vector<1x32xf32>
    %58 = math.tanh %57 : vector<1x32xf32>
    %59 = vector.extract_strided_slice %31 {offsets = [8, 0], sizes = [64, 32], strides = [1, 1]} : vector<72x32xf32> to vector<64x32xf32>
    %60 = vector.broadcast %11 : vector<1x32xf32> to vector<64x32xf32>
    %61 = arith.addf %59, %60 : vector<64x32xf32>
    %c63_i32 = arith.constant 63 : i32
    %62 = tpu.dynamic_rotate %61 by %c63_i32 dim 0 : vector<64x32xf32>, i32 -> vector<64x32xf32>
    %63 = arith.maximumf %61, %62 : vector<64x32xf32>
    %c62_i32 = arith.constant 62 : i32
    %64 = tpu.dynamic_rotate %61 by %c62_i32 dim 0 : vector<64x32xf32>, i32 -> vector<64x32xf32>
    %65 = arith.maximumf %63, %64 : vector<64x32xf32>
    %c61_i32 = arith.constant 61 : i32
    %66 = tpu.dynamic_rotate %61 by %c61_i32 dim 0 : vector<64x32xf32>, i32 -> vector<64x32xf32>
    %67 = arith.maximumf %65, %66 : vector<64x32xf32>
    %cst_38 = arith.constant dense<0.000000e+00> : vector<64x32xf32>
    %68 = tpu.matmul %67, %21, %cst_38 {dimension_numbers = #tpu.dot_dimension_numbers<[1], [1], [0], [0], [0, 0, 1, 0], [], []>} : vector<64x32xf32>, vector<32x32xf32>, vector<64x32xf32> -> vector<64x32xf32>
    %69 = vector.broadcast %13 : vector<1x32xf32> to vector<64x32xf32>
    %70 = arith.addf %68, %69 : vector<64x32xf32>
    %71 = vector.broadcast %58 : vector<1x32xf32> to vector<64x32xf32>
    %72 = arith.mulf %71, %70 : vector<64x32xf32>
    %cst_39 = arith.constant dense<0.000000e+00> : vector<4x32xf32>
    %73 = tpu.matmul %23, %72, %cst_39 {dimension_numbers = #tpu.dot_dimension_numbers<[1], [0], [0], [1], [0, 0, 1, 1], [], []>} : vector<4x64xf32>, vector<64x32xf32>, vector<4x32xf32> -> vector<4x32xf32>
    %74 = vector.broadcast %17 : vector<1x1xf32> to vector<4x32xf32>
    %75 = arith.addf %73, %74 : vector<4x32xf32>
    %76 = math.tanh %75 : vector<4x32xf32>
    %cst_40 = arith.constant dense<0.000000e+00> : vector<4x32xf32>
    %77 = tpu.matmul %76, %22, %cst_40 {dimension_numbers = #tpu.dot_dimension_numbers<[1], [1], [0], [0], [0, 0, 1, 0], [], []>} : vector<4x32xf32>, vector<32x32xf32>, vector<4x32xf32> -> vector<4x32xf32>
    %78 = vector.broadcast %14 : vector<1x32xf32> to vector<4x32xf32>
    %79 = arith.addf %77, %78 : vector<4x32xf32>
    %80 = math.tanh %79 : vector<4x32xf32>
    %cst_41 = arith.constant dense<0.000000e+00> : vector<1x4xf32>
    %81 = tpu.matmul %15, %80, %cst_41 {dimension_numbers = #tpu.dot_dimension_numbers<[1], [1], [0], [0], [0, 0, 1, 0], [], []>} : vector<1x32xf32>, vector<4x32xf32>, vector<1x4xf32> -> vector<1x4xf32>
    %82 = vector.broadcast %18 : vector<1x1xf32> to vector<1x4xf32>
    %83 = arith.addf %81, %82 : vector<1x4xf32>
    %84 = math.tanh %83 : vector<1x4xf32>
    %85 = arith.addf %50, %84 : vector<1x4xf32>
    %cst_42 = arith.constant dense<0xFF800000> : vector<1xf32>
    %86 = vector.multi_reduction <maximumf>, %85, %cst_42 [1] : vector<1x4xf32> to vector<1xf32>
    %87 = vector.shape_cast %86 : vector<1xf32> to vector<1x1xf32>
    %88 = vector.broadcast %87 : vector<1x1xf32> to vector<1x4xf32>
    %89 = arith.subf %85, %88 : vector<1x4xf32>
    %90 = math.exp %89 : vector<1x4xf32>
    %cst_43 = arith.constant dense<0.000000e+00> : vector<1xf32>
    %91 = vector.multi_reduction <add>, %90, %cst_43 [1] : vector<1x4xf32> to vector<1xf32>
    %92 = vector.shape_cast %91 : vector<1xf32> to vector<1x1xf32>
    %93 = math.log %92 : vector<1x1xf32>
    %94 = vector.broadcast %93 : vector<1x1xf32> to vector<1x4xf32>
    %95 = arith.subf %89, %94 : vector<1x4xf32>
    %c0_44 = arith.constant 0 : index
    %c0_45 = arith.constant 0 : index
    %c0_46 = arith.constant 0 : index
    %96 = vector.load %arg5[%c0_44, %c0_45, %c0_46] : memref<1x1x4xf32, #tpu.memory_space<vmem>>, vector<1x1x4xf32>
    %97 = vector.shape_cast %96 : vector<1x1x4xf32> to vector<1x4xf32>
    %98 = vector.shape_cast %95 : vector<1x4xf32> to vector<1x1x4xf32>
    tpu.vector_store %arg5[%c0_44, %c0_45, %c0_46], %98 {strides = array<i32>} : memref<1x1x4xf32, #tpu.memory_space<vmem>>, vector<1x1x4xf32>,
    return
  }
  func.func @transform_0(%arg0: i32) -> (i32, i32, i32) {
    %c0_i32 = arith.constant 0 : i32
    %c0_i32_0 = arith.constant 0 : i32
    %c0_i32_1 = arith.constant 0 : i32
    return %arg0, %c0_i32, %c0_i32_0 : i32, i32, i32
  }
  func.func @transform_1(%arg0: i32) -> (i32, i32, i32) {
    %c0_i32 = arith.constant 0 : i32
    %c0_i32_0 = arith.constant 0 : i32
    %c0_i32_1 = arith.constant 0 : i32
    return %arg0, %c0_i32, %c0_i32_0 : i32, i32, i32
  }
  func.func @transform_2(%arg0: i32) -> (i32, i32) {
    %c0_i32 = arith.constant 0 : i32
    %c0_i32_0 = arith.constant 0 : i32
    %c0_i32_1 = arith.constant 0 : i32
    return %c0_i32, %c0_i32_0 : i32, i32
  }
  func.func @transform_3(%arg0: i32) -> (i32, i32) {
    %c0_i32 = arith.constant 0 : i32
    %c0_i32_0 = arith.constant 0 : i32
    %c0_i32_1 = arith.constant 0 : i32
    return %c0_i32, %c0_i32_0 : i32, i32
  }
  func.func @transform_4(%arg0: i32) -> (i32, i32, i32) {
    %c0_i32 = arith.constant 0 : i32
    %c0_i32_0 = arith.constant 0 : i32
    %c0_i32_1 = arith.constant 0 : i32
    return %arg0, %c0_i32, %c0_i32_0 : i32, i32, i32
  }
}

</mosaic_0001>

<bundles_post_ra>
// kernel: duet_forward.1
= control target key start
LH: loop header
LB: loop body
LE: loop exit
PB: predicated region body
PF: predicated region fallthrough
CT: control target
= control target key end

     0   :  { %9 = vsyncpa [#allocation3], 0  ;;  %s2719_s0 = inlined_call_operand.vmem [shape: bf16[2,72,16], index: 0, kind: input, shape index: {}]   ;;  %s2720_s1 = inlined_call_operand.vmem [shape: bf16[2,4,256], index: 1, kind: input, shape index: {}]   ;;  %s2721_s2 = inlined_call_operand.vmem [shape: bf16[145,256], index: 2, kind: input, shape index: {}]   ;;  %s2722_s3 = inlined_call_operand.vmem [shape: f32[148,64], index: 3, kind: input, shape index: {}]   ;;  %s2723_s4 = inlined_call_operand.hbm [shape: f32[2,1,4], index: 4, kind: output, shape index: {}]  }
   0x1   :  { %11 = vsyncpa [#allocation3 + $0x1], 0  ;;  %s2097_s15 = smov 0   ;;  %s2099_s16 = smov 0  }
   0x2   :  { %s2101_s17 = smov 0   ;;  %s2103_s18 = smov 0  }
   0x3 LB: > { %s2118_s19 = sadd.s32 4294967295, %s2060_s18   ;;  %s1614_s20 = sadd.s32 4294967294, %s2060_s18   ;;  %s2060_s18 = sphi %s2103_s18, %s2731_s18   ;;  %s2056_s17 = sphi %s2101_s17, %s2730_s17   ;;  %s2052_s16 = sphi %s2099_s16, %s2729_s16   ;;  %s2048_s15 = sphi %s2097_s15, %s2728_s15  }
   0x4   : > { %s2122_s21 = sadd.s32 1, %s2060_s18   ;;  %s118_s22 = sadd.s32 1, %s2056_s17 }
   0x5   : > { %s115_s23 = ssub.s32 %s2060_s18, %s2122_s21  ;;  %p128_p0 = scmp.ne.s32.totalorder %s2056_s17, %s2052_s16 }
   0x6   : > { %p116_p1 = scmp.eq.s32.totalorder %s115_s23, 0  ;;  %p129_p2 = scmp.eq.s32.totalorder %s2118_s19, 1 }
   0x7   : > { %p134_p3 = scmp.ne.s32.totalorder %s2052_s16, %s2048_s15  ;;  %p135_p4 = scmp.eq.s32.totalorder %s1614_s20, 1 }
   0x8   : > { %s2133_s24 = scalar_select %p116_p1, %s2056_s17, %s118_s22  }
   0x9   : > { %p2135_p5 = por %p129_p2, %p128_p0  ;;  %p2139_p6 = por %p135_p4, %p134_p3 }
   0xa   : > { %p1617_p7 = scmp.ge.s32.totalorder %s2060_s18, 1  ;;  %p175_p8 = scmp.lt.s32.totalorder %s2060_s18, 3 }
   0xc   : > { %p176_p9 = pnand %p1617_p7, %p175_p8 }
   0xd   : > { %p205_p10 = scmp.lt.s32.totalorder (!%p176_p9), %s2118_s19, 1  ;;  %v2062_v0 = vmov (!%p176_p9), 0.0   ;;  %vm2063_vm0 = vmmov (!%p176_p9), 0   ;;  %vm555_vm1 = vcmask (!%p176_p9), 1043456   ;;  %vm551_vm2 = vcmask (!%p176_p9), 64512   ;;  %s2065_s23 = smov (!%p176_p9), 64  }
   0xe   : > { %179 = sbr.rel (%p176_p9) target bundleno = 2204 (0x89c), region = 36  ;;  %1771 = vmatprep.subr.bf16.mxu1 (!%p176_p9), %v2062_v0  ;;  %1773 = vmatprep.mubr.msk.bf16.mxu1 (!%p176_p9), %vm2063_vm0, %v2062_v0  ;;  %v1963_v1 = vld [vmem:[%s2721_s2 + $0x24] ss:$8 sps:$4 sm:$0xff] (!%p176_p9)   ;;  %v244_v3 = vld [vmem:[%s2721_s2 + $0x90] sm:$0x1] (!%p176_p9)  ;;  %v2064_v6 = vmov (!%p176_p9), 0   ;;  %v475_v47 = vlaneseq (!%p176_p9) }
   0xf   : > { %1739 = vmatprep.subr.bf16.mxu0 (!%p176_p9), %v2062_v0  ;;  %1751 = vmatprep.mubr.msk.bf16.mxu0 (!%p176_p9), %vm2063_vm0, %v2062_v0  ;;  %v1961_v4 = vld [vmem:[%s2721_s2 + $0x20] ss:$8 sps:$4 sm:$0xff] (!%p176_p9)   ;;  %v1964_v7 = vld [vmem:[%s2721_s2 + $0x30] ss:$8 sps:$4 sm:$0xff] (!%p176_p9)   ;;  %vm324_vm3 = vcmask (!%p176_p9), 130048   ;;  %v2067_v46 = vmov (!%p176_p9), 0.0|0.0  }
  0x10   : > { %1958 = vset.pattern.permute.xlu1 (!%p176_p9), %v2064_v6  ;;  %v341_v8 = vsel (!%p176_p9), %vm324_vm3, %v1964_v7, 0  ;;  %v1965_v9 = vld [vmem:[%s2721_s2 + $0x40] ss:$8 sps:$4 sm:$0xff] (!%p176_p9)   ;;  %v1966_v11 = vld [vmem:[%s2721_s2 + $0x50] ss:$8 sps:$4 sm:$0xff] (!%p176_p9)   ;;  %v2271_v48 = vshrl.u32 (!%p176_p9), %v475_v47, 7 }
  0x11   : > { %1740 = vmatpush3.bf16.xpose.msra.mxu0 (!%p176_p9), %v341_v8  ;;  %v344_v10 = vsel (!%p176_p9), %vm324_vm3, %v1965_v9, 0  ;;  %v347_v12 = vsel (!%p176_p9), %vm324_vm3, %v1966_v11, 0  ;;  %v1967_v13 = vld [vmem:[%s2721_s2 + $0x60] ss:$8 sps:$4 sm:$0xff] (!%p176_p9)   ;;  %v1968_v15 = vld [vmem:[%s2721_s2 + $0x70] ss:$8 sps:$4 sm:$0xff] (!%p176_p9)  }
  0x12   : > { %1741 = vmatprep.subr.bf16.mxu0 (!%p176_p9), %v2062_v0  ;;  %v350_v14 = vsel (!%p176_p9), %vm324_vm3, %v1967_v13, 0  ;;  %v353_v16 = vsel (!%p176_p9), %vm324_vm3, %v1968_v15, 0  ;;  %v1969_v17 = vld [vmem:[%s2721_s2 + $0x80] ss:$8 sps:$4 sm:$0xff] (!%p176_p9)   ;;  %v1974_v29 = vld [vmem:[%s2721_s2 + $0x4] ss:$8 sps:$4 sm:$0xff] (!%p176_p9)  }
  0x13   : > { %v356_v18 = vsel (!%p176_p9), %vm324_vm3, %v1969_v17, 0  ;;  %v1972_v30 = vld [vmem:[%s2721_s2] ss:$8 sps:$4 sm:$0xff] (!%p176_p9)   ;;  %v1978_v32 = vld [vmem:[%s2721_s2 + $0x14] ss:$8 sps:$4 sm:$0xff] (!%p176_p9)   ;;  %v2274_v53 = vsub.s32 (!%p176_p9), 0, %v2271_v48 }
  0x14   : > { %v1976_v33 = vld [vmem:[%s2721_s2 + $0x10] ss:$8 sps:$4 sm:$0xff] (!%p176_p9)   ;;  %v2068_v49 = vmov (!%p176_p9), 1983009808   ;;  %vm762_vm4 = vcmask (!%p176_p9), 261120   ;;  %vm477_vm6 = vcmp.lt.s32.totalorder (!%p176_p9), %v2271_v48, 7 }
  0x15   : > { %s2150_s27 = scalar_select %p205_p10, %s2118_s19, 1  ;;  %v674_v50 = vunpack.c.l.s4 %v2068_v49  ;;  %vm2291_vm5 = vmpackc.low %vm762_vm4, %vm762_vm4  ;;  %vm532_vm7 = vcmp.lt.s32.totalorder %v2271_v48, 6  ;;  %vm1094_vm8 = vcmp.lt.s32.totalorder %v2271_v48, 5  ;;  %vm936_vm9 = vcmask 259072  }
  0x16   : > { %s2069_s6 = smov 127   ;;  %vm1273_vm10 = vcmask 523264   ;;  %vm1520_vm11 = vcmask 24576   ;;  %s203_s9 = sand.u32 1, %s2052_s16  }
  0x17   : > { %s1907_s28 = smul.u32 36, %s2150_s27  ;;  %v675_v56 = vunpack.c.0.s8 %v674_v50  ;;  %s1682_s10 = sshll.u32 %s2118_s19, 4 }
  0x18   : > { %s204_s11 = scalar_lea.vmem [#allocation2], %s203_s9  ;;  %s2676_s20 = scalar_lea.hbm %s2723_s4, %s1682_s10 }
  0x19   : > { %s2162_s7 = scalar_lea.vmem %s2719_s0, %s1907_s28  ;;  %1742 = vmatpush3.bf16.xpose.msra.mxu0 %v344_v10  ;;  %s1685_s28 = sshll.u32 %s2150_s27, 2  ;;  %v678_v63 = vsub.s32 %v675_v56, %v2271_v48  ;;  %v259_v48 = vld [vmem:[%s2722_s3 + $0x38] sm:$0xff] }
  0x1a   : > { %v216_v2 = vld [vmem:[%s2162_s7] sm:$0xf]  ;;  %1743 = vmatprep.subr.bf16.mxu0 %v2062_v0  ;;  %v217_v19 = vld [vmem:[%s2162_s7 + $0x4] sm:$0xf]  ;;  %v1970_v21 = vld [vmem:[%s2162_s7 + $0x8] sm:$0xff]   ;;  %s214_s5 = scalar_lea.vmem %s2720_s1, %s1685_s28  ;;  %s1547_s12 = sshll.u32 %s204_s11, 4  ;;  %s2678_s12 = int_to_ptr.vmem [resolvable:$true] %s1547_s12 }
  0x1b   : > { %v557_v5 = vsel %vm555_vm1, %v216_v2, 0  ;;  %v1621_v20 = vcombine.low %v216_v2, %v217_v19  ;;  %v1971_v22 = vld [vmem:[%s2162_s7 + $0x10] sm:$0xff]   ;;  %v1975_v28 = vld [vmem:[%s2162_s7 + $0x18] sm:$0xff]   ;;  %v1979_v31 = vld [vmem:[%s2162_s7 + $0x20] ss:$0 sps:$4 sm:$0xff]   ;;  %s2066_s7 = smov 96  }
  0x1c   : > { %1772 = vmatpush3.bf16.msra.mxu1 %v557_v5  ;;  %v225_v2 = vld [vmem:[%s214_s5] sm:$0xf]  ;;  %v254_v5 = vld [vmem:[%s2722_s3 + $0x10] sm:$0xff]  ;;  %s1535_s22 = scalar_lea.sflag [#allocation3], %s203_s9  ;;  %s2071_s19 = smov [#allocation2]  }
  0x1d   : > { %613 = vmatprep.subr.bf16.mxu1 %v1963_v1  ;;  %v256_v19 = vld [vmem:[%s2722_s3 + $0x20] sm:$0xff] }
  0x1f   : > { %1774 = vmatmul.mubr.msk.bf16.vlgmr.msra.gmra.mrb[0].mxu1 %vm551_vm2, %v244_v3 }
  0x20   : > { %614 = vmatpush1.bf16.msra.mxu1 %v1961_v4  ;;  %645 = vmatprep.mubr.bf16.mxu1 %v2064_v6  ;;  %v255_v6 = vld [vmem:[%s2722_s3 + $0x18] sm:$0xff] }
  0x21   : > { %1744 = vmatpush3.bf16.xpose.msra.mxu0 %v347_v12  ;;  %717 = vmatprep.subr.bf16.mxu1 %v1974_v29  ;;  %v1860_v9 = vpack.c.bf16 %v255_v6, %v254_v5 }
  0x22   : > { %1745 = vmatprep.subr.bf16.mxu0 %v2062_v0 }
  0x29   : > { %1746 = vmatpush3.bf16.xpose.msra.mxu0 %v350_v14 }
  0x2a   : > { %1747 = vmatprep.subr.bf16.mxu0 %v2062_v0 }
  0x31   : > { %1748 = vmatpush3.bf16.xpose.msra.mxu0 %v353_v16 }
  0x32   : > { %1749 = vmatprep.subr.bf16.mxu0 %v2062_v0 }
  0x39   : > { %1750 = vmatpush3.bf16.xpose.msra.mxu0 %v356_v18 }
  0x3a   : > { %1887 = vmatprep.subr.bf16.mxu0 %v2067_v46 }
  0x40   : > { %1752 = vmatmul.mubr.msk.bf16.vlgmr.msra.gmra.mrb[0].mxu0 %vm324_vm3, %v1621_v20  ;;  %v257_v20 = vld [vmem:[%s2722_s3 + $0x28] sm:$0xff] }
  0x41   : > { %1755 = vmatprep.mubr.msk.bf16.mxu0 %vm2063_vm0, %v2062_v0 }
  0x48   : > { %1756 = vmatmul.mubr.msk.bf16.gmra.mrb[4].mxu0 %vm324_vm3, %v1970_v21  ;;  %v1864_v21 = vpack.c.bf16 %v257_v20, %v256_v19 }
  0x49   : > { %1759 = vmatprep.mubr.msk.bf16.mxu0 %vm2063_vm0, %v2062_v0 }
  0x50   : > { %1760 = vmatmul.mubr.msk.bf16.gmra.mrb[8].mxu0 %vm324_vm3, %v1971_v22 }
  0x51   : > { %1763 = vmatprep.mubr.msk.bf16.mxu0 %vm2063_vm0, %v2062_v0 }
  0x58   : > { %1764 = vmatmul.mubr.msk.bf16.gmra.mrb[12].mxu0 %vm324_vm3, %v1975_v28 }
  0x59   : > { %1767 = vmatprep.mubr.msk.bf16.mxu0 %vm2063_vm0, %v2062_v0 }
  0x60   : > { %1768 = vmatmul.mubr.msk.bf16.gmra.mrb[16].mxu0 %vm324_vm3, %v1979_v31 }
  0x61   : > { %1840 = vmatprep.mubr.msk.f32.mxu0 %vm2063_vm0, %v2062_v0 }
  0xf2   : > { %v593_v23 = vpop.f32.mrb[0].mxu1 }
  0xf3   : > { %v599_v24 = vpack.c.bf16 %v593_v23, %v593_v23  ;;  %v1775_v25 = vpop.f32.mrb[1].mxu1 }
  0xf4   : > { %v596_v26 = vpop.f32.mrb[2].mxu1 }
  0xf5   : > { %v1776_v27 = vpop.f32.mrb[3].mxu1  ;;  %1640 = vmatmul.mubr.msk.bf16.vlgmr.msra.gmra.mrb[4].mxu1 %vm324_vm3, %v599_v24 }
  0xf6   : > { %718 = vmatpush1.bf16.xpose.msra.mxu1 %v1972_v30 }
  0xf7   : > { %719 = vmatprep.subr.bf16.mxu1 %v1978_v32 }
  0xfe   : > { %720 = vmatpush1.bf16.xpose.msra.mxu1 %v1976_v33 }
  0xff   : > { %1859 = vmatprep.subr.bf16.mxu1 %v2067_v46 }
 0x113   : > { %v2233_v34 = vpop.f32.mrb[0].mxu0 }
 0x114   : > { %496 = vrot.lane.b32.xlu1 %v2233_v34, %s2065_s23  ;;  %v1753_v35 = vpop.f32.mrb[1].mxu0  ;;  %439 = vrot.lane.b32.xlu0 %v2233_v34, %s2066_s7 }
 0x115   : > { %v2239_v36 = vpop.f32.mrb[2].mxu0 }
 0x116   : > { %v1754_v37 = vpop.f32.mrb[3].mxu0 }
 0x118   : > { %498 = vrot.lane.b32.xlu1 %v2239_v36, %s2065_s23  ;;  %441 = vrot.lane.b32.xlu0 %v2239_v36, %s2066_s7 }
 0x11b   : > { %v2245_v38 = vpop.f32.mrb[4].mxu0 }
 0x11c   : > { %500 = vrot.lane.b32.xlu1 %v2245_v38, %s2065_s23  ;;  %v1757_v39 = vpop.f32.mrb[5].mxu0  ;;  %443 = vrot.lane.b32.xlu0 %v2245_v38, %s2066_s7 }
 0x11d   : > { %v2251_v40 = vpop.f32.mrb[6].mxu0 }
 0x11e   : > { %v1758_v41 = vpop.f32.mrb[7].mxu0 }
 0x120   : > { %445 = vrot.lane.b32.xlu1 %v2251_v40, %s2066_s7  ;;  %502 = vrot.lane.b32.xlu0 %v2251_v40, %s2065_s23 }
 0x123   : > { %v2257_v42 = vpop.f32.mrb[8].mxu0 }
 0x124   : > { %504 = vrot.lane.b32.xlu1 %v2257_v42, %s2065_s23  ;;  %v1761_v43 = vpop.f32.mrb[9].mxu0  ;;  %447 = vrot.lane.b32.xlu0 %v2257_v42, %s2066_s7 }
 0x125   : > { %v2263_v44 = vpop.f32.mrb[10].mxu0 }
 0x126   : > { %v1762_v45 = vpop.f32.mrb[11].mxu0 }
 0x128   : > { %449 = vrot.lane.b32.xlu0 %v2263_v44, %s2066_s7 }
 0x12b   : > { %v2300_v11 = vpop.f32.mrb[12].mxu0 }
 0x12c   : > { %506 = vrot.lane.b32.xlu0 %v2263_v44, %s2065_s23  ;;  %451 = vrot.lane.b32.xlu1 %v2300_v11, %s2066_s7  ;;  %v1765_v12 = vpop.f32.mrb[13].mxu0 }
 0x12d   : > { %v2304_v13 = vpop.f32.mrb[14].mxu0 }
 0x12e   : > { %v1766_v14 = vpop.f32.mrb[15].mxu0 }
 0x130   : > { %453 = vrot.lane.b32.xlu0 %v2304_v13, %s2066_s7  ;;  %508 = vrot.lane.b32.xlu1 %v2300_v11, %s2065_s23 }
 0x133   : > { %v424_v15 = vpop.f32.mrb[16].mxu0 }
 0x134   : > { %510 = vrot.lane.b32.xlu0 %v2304_v13, %s2065_s23  ;;  %455 = vrot.lane.b32.xlu1 %v424_v15, %s2066_s7  ;;  %v1769_v16 = vpop.f32.mrb[17].mxu0  ;;  %s2002_s7 = sshll.u32 %s2071_s19, 4  ;;  %s2003_s7 = int_to_ptr.vmem [resolvable:$false] %s2002_s7 }
 0x135   : > { %v427_v17 = vpop.f32.mrb[18].mxu0  ;;  %v2368_v16 = vld [vmem:[%s2722_s3 + $0x3] ss:$0 sm:$0xff]  ;;  %s2004_s28 = scalar_lea.vmem %s2003_s7, 32  ;;  %p2005_p0 = scmp.lt.s32.totalorder %s2678_s12, %s2003_s7 }
 0x136   : > { %v1770_v18 = vpop.f32.mrb[19].mxu0 }
 0x138   : > { %512 = vrot.lane.b32.xlu1 %v424_v15, %s2065_s23  ;;  %s1998_s23 = scalar_lea.vmem %s2678_s12, 16 }
 0x139   : > { %p1999_p11 = scmp.ne.s32.totalorder %s2678_s12, %s1998_s23  ;;  %p2006_p1 = scmp.lt.s32.totalorder %s2004_s28, %s1998_s23 }
 0x13b   : > { %p2000_p12 = pnand %p1999_p11, %p2135_p5  ;;  %p2007_p2 = por %p2006_p1, %p2005_p0 }
 0x13d   : > { %p2001_p13 = pneg %p2000_p12 }
 0x13f   : > { %p2008_p3 = pnand %p2007_p2, %p2001_p13 }
 0x186   : > { %v2323_v22 = vpop.permute.xlu0 %439  ;;  %v2325_v23 = vpop.permute.xlu1 %496 }
 0x18a   : > { %v2327_v24 = vpop.permute.xlu0 %441  ;;  %v2329_v25 = vpop.permute.xlu1 %498 }
 0x18b   : > { %v467_v45 = vrot.slane %v2327_v24, 1 }
 0x18e   : > { %v444_v26 = vpop.permute.xlu0 %443  ;;  %v501_v27 = vpop.permute.xlu1 %500 }
 0x18f   : > { %v468_v35 = vrot.slane %v444_v26, 1  ;;  %v525_v43 = vrot.slane %v501_v27, 2 }
 0x192   : > { %v503_v28 = vpop.permute.xlu0 %502  ;;  %v446_v29 = vpop.permute.xlu1 %445 }
 0x193   : > { %v469_v33 = vrot.slane %v446_v29, 1  ;;  %v526_v49 = vrot.slane %v503_v28, 2 }
 0x195   : > { %v483_v47 = vsel %vm477_vm6, %v468_v35, %v469_v33 }
 0x196   : > { %v448_v30 = vpop.permute.xlu0 %447  ;;  %v505_v31 = vpop.permute.xlu1 %504 }
 0x197   : > { %v470_v39 = vrot.slane %v448_v30, 1 }
 0x199   : > { %v482_v56 = vsel %vm477_vm6, %v469_v33, %v470_v39 }
 0x19a   : > { %v450_v32 = vpop.permute.xlu0 %449 }
 0x19e   : > { %v452_v37 = vpop.permute.xlu1 %451  ;;  %v507_v41 = vpop.permute.xlu0 %506 }
 0x1a2   : > { %v509_v50 = vpop.permute.xlu1 %508 }
 0x1a3   : > { %v529_v26 = vrot.slane %v509_v50, 2 }
 0x1c8   : > { %v647_v51 = vpop.f32.mrb[4].mxu1 }
 0x1c9   : > { %v654_v52 = vpack.c.bf16 %v647_v51, %v647_v51  ;;  %v649_v54 = vpop.f32.mrb[5].mxu1  ;;  %v471_v51 = vrot.slane %v450_v32, 1 }
 0x1ca   : > { %v655_v55 = vpack.c.bf16 %v649_v54, %v649_v54  ;;  %v651_v57 = vpop.f32.mrb[6].mxu1  ;;  %v527_v54 = vrot.slane %v505_v31, 2 }
 0x1cb   : > { %v657_v58 = vpack.i.b16 %v654_v52, %v654_v52  ;;  %v652_v59 = vpop.f32.mrb[7].mxu1  ;;  %v484_v52 = vsel %vm477_vm6, %v467_v45, %v468_v35  ;;  %v524_v57 = vrot.slane %v2329_v25, 2 }
 0x1cc   : > { %v664_v60 = vpack.i.b16 %v655_v55, %v655_v55  ;;  %v489_v55 = vadd.f32 %v483_v47, %v2245_v38  ;;  %v488_v59 = vadd.f32 %v484_v52, %v2239_v36 }
 0x1cd   : > { %v662_v61 = vrot.slane %v657_v58, %v2274_v53  ;;  %v538_v58 = vsel %vm532_vm7, %v525_v43, %v526_v49  ;;  %v539_v38 = vsel %vm532_vm7, %v524_v57, %v525_v43 }
 0x1ce   : > { %v669_v62 = vrot.slane %v664_v60, %v2274_v53  ;;  %v456_v60 = vpop.permute.xlu1 %455  ;;  %v544_v36 = vadd.f32 %v538_v58, %v489_v55 }
 0x1d0   : > { %v672_v1 = vcombine.low %v662_v61, %v669_v62  ;;  %v481_v61 = vsel %vm477_vm6, %v470_v39, %v471_v51  ;;  %v528_v62 = vrot.slane %v507_v41, 2  ;;  %v2371_v19 = vadd.f32 %v2368_v16, %v544_v36 }
 0x1d1   : > { %v491_v6 = vadd.f32 %v481_v61, %v2257_v42 }
 0x1d2   : > { %v679_v3 = vrot.slane %v672_v1, %v678_v63  ;;  %v466_v1 = vrot.slane %v2323_v22, 1  ;;  %v513_v12 = vpop.permute.xlu1 %512  ;;  %v536_v14 = vsel %vm532_vm7, %v527_v54, %v528_v62  ;;  %v1039_v32 = vrot.slane %v2371_v19, 1 }
 0x1d3   : > { %v531_v17 = vrot.slane %v513_v12, 2  ;;  %v535_v43 = vsel %vm532_vm7, %v528_v62, %v529_v26  ;;  %v1087_v62 = vrot.slane %v2371_v19, 3  ;;  %v1641_v12 = vld [vmem:[%s2722_s3] ss:$0 sm:$0xff] }
 0x1d4   : > { %v681_v4 = vmul.bf16 %v679_v3, %v225_v2  ;;  %v474_v2 = vrot.slane %v456_v60, 1  ;;  %v490_v3 = vadd.f32 %v482_v56, %v2251_v40  ;;  %v523_v40 = vrot.slane %v2325_v23, 2  ;;  %v258_v23 = vld [vmem:[%s2722_s3 + $0x30] sm:$0xff] }
 0x1d6   : > { %v693_v7 = vrot.slane %v681_v4, %v678_v63  ;;  %v454_v63 = vpop.permute.xlu0 %453  ;;  %v537_v4 = vsel %vm532_vm7, %v526_v49, %v527_v54  ;;  %v486_v5 = vsel %vm477_vm6, %v474_v2, %v466_v1  ;;  %v1063_v54 = vrot.slane %v2371_v19, 2 }
 0x1d7   : > { %v545_v18 = vadd.f32 %v537_v4, %v490_v3  ;;  %v473_v42 = vrot.slane %v454_v63, 1 }
 0x1d8   : > { %v694_v8 = vcombine.high %v693_v7, %v693_v7 }
 0x1d9   : > { %v2381_v30 = vadd.f32 %v2368_v16, %v545_v18  ;;  %v478_v36 = vsel %vm477_vm6, %v473_v42, %v474_v2 }
 0x1da   : > { %749 = vmatprep.mubr.bf16.mxu1 %v694_v8  ;;  %v543_v8 = vadd.f32 %v539_v38, %v488_v59  ;;  %v511_v20 = vpop.permute.xlu0 %510  ;;  %v494_v18 = vadd.f32 %v478_v36, %v2304_v13 }
 0x1db   : > { %750 = vmatmul.mubr.bf16.vlgmr.msra.gmra.mrb[8].mxu1 %v693_v7  ;;  %v472_v7 = vrot.slane %v452_v37, 1  ;;  %v530_v31 = vrot.slane %v511_v20, 2  ;;  %v1040_v49 = vrot.slane %v2381_v30, 1  ;;  %v1064_v2 = vrot.slane %v2381_v30, 2 }
 0x1dc   : > { %1862 = vmatpush3.bf16.xpose.msk.msra.mxu1 %vm2291_vm5, %v1860_v9  ;;  %1785 = vmatprep.mubr.msk.f32.mxu1 %vm2063_vm0, %v2062_v0  ;;  %v495_v9 = vadd.f32 %v486_v5, %v424_v15  ;;  %v541_v15 = vsel %vm532_vm7, %v531_v17, %v523_v40  ;;  %v1030_v27 = vadd.f32 %v2368_v16, %v543_v8 }
 0x1dd   : > { %1863 = vmatprep.subr.bf16.mxu1 %v2067_v46  ;;  %v480_v29 = vsel %vm477_vm6, %v471_v51, %v472_v7  ;;  %v479_v35 = vsel %vm477_vm6, %v472_v7, %v473_v42  ;;  %v534_v51 = vsel %vm532_vm7, %v529_v26, %v530_v31 }
 0x1de   : > { %v550_v28 = vadd.f32 %v541_v15, %v495_v9  ;;  %v492_v37 = vadd.f32 %v480_v29, %v2263_v44  ;;  %v1038_v47 = vrot.slane %v1030_v27, 1  ;;  %v493_v50 = vadd.f32 %v479_v35, %v2300_v11 }
 0x1df   : > { %v1062_v44 = vrot.slane %v1030_v27, 2  ;;  %v1086_v61 = vrot.slane %v1030_v27, 3  ;;  %v533_v15 = vsel %vm532_vm7, %v530_v31, %v531_v17  ;;  %v1088_v17 = vrot.slane %v2381_v30, 3 }
 0x1e0   : > { %v2385_v33 = vadd.f32 %v2368_v16, %v550_v28  ;;  %v1052_v52 = vsel %vm477_vm6, %v1038_v47, %v1039_v32  ;;  %v547_v56 = vadd.f32 %v535_v43, %v492_v37  ;;  %v548_v38 = vadd.f32 %v534_v51, %v493_v50 }
 0x1e1   : > { %v1054_v59 = vmax.f32 %v1030_v27, %v1052_v52  ;;  %v1076_v60 = vsel %vm532_vm7, %v1062_v44, %v1063_v54  ;;  %v2421_v5 = vsel %vm1094_vm8, %v1086_v61, %v1087_v62  ;;  %v1075_v43 = vsel %vm532_vm7, %v1063_v54, %v1064_v2 }
 0x1e2   : > { %v1045_v41 = vrot.slane %v2385_v33, 1  ;;  %v1069_v55 = vrot.slane %v2385_v33, 2  ;;  %v1093_v63 = vrot.slane %v2385_v33, 3  ;;  %v1035_v42 = vadd.f32 %v2368_v16, %v548_v38 }
 0x1e3   : > { %v2413_v3 = vmax.f32 %v1054_v59, %v1076_v60  ;;  %v2467_v54 = vsel %vm1094_vm8, %v1087_v62, %v1088_v17 }
 0x1e4   : > { %1866 = vmatpush3.bf16.xpose.msk.msra.mxu1 %vm2291_vm5, %v1864_v21  ;;  %v546_v21 = vadd.f32 %v536_v14, %v491_v6  ;;  %v1053_v11 = vsel %vm477_vm6, %v1045_v41, %v1038_v47  ;;  %v1077_v6 = vsel %vm532_vm7, %v1069_v55, %v1062_v44  ;;  %v2431_v7 = vsel %vm1094_vm8, %v1093_v63, %v1086_v61 }
 0x1e5   : > { %1788 = vmatprep.subr.mxu1 %v2062_v0  ;;  %v1061_v4 = vmax.f32 %v2385_v33, %v1053_v11  ;;  %v1103_v8 = vmax.f32 %v2413_v3, %v2421_v5  ;;  %v1034_v14 = vadd.f32 %v2368_v16, %v547_v56  ;;  %v549_v47 = vadd.f32 %v533_v15, %v494_v18  ;;  %v266_v3 = vld [vmem:[%s2722_s3 + $0x70] sm:$0xff]  ;;  %v267_v5 = vld [vmem:[%s2722_s3 + $0x78] sm:$0xff] }
 0x1e6   : > { %v2391_v39 = vadd.f32 %v2368_v16, %v546_v21  ;;  %v1051_v21 = vsel %vm477_vm6, %v1039_v32, %v1040_v49  ;;  %v1043_v44 = vrot.slane %v1035_v42, 1  ;;  %v1067_v38 = vrot.slane %v1035_v42, 2 }
 0x1e7   : > { %v2435_v9 = vmax.f32 %v1061_v4, %v1077_v6  ;;  %v1055_v29 = vmax.f32 %v2371_v19, %v1051_v21  ;;  %v1042_v52 = vrot.slane %v1034_v14, 1  ;;  %v1036_v11 = vadd.f32 %v2368_v16, %v549_v47 }
 0x1e8   : > { %v1041_v58 = vrot.slane %v2391_v39, 1  ;;  %v1065_v27 = vrot.slane %v2391_v39, 2  ;;  %v1089_v19 = vrot.slane %v2391_v39, 3  ;;  %v1066_v61 = vrot.slane %v1034_v14, 2 }
 0x1e9   : > { %v1110_v20 = vmax.f32 %v2435_v9, %v2431_v7  ;;  %v1048_v62 = vsel %vm477_vm6, %v1042_v52, %v1043_v44  ;;  %v1091_v18 = vrot.slane %v1035_v42, 3 }
 0x1ea   : > { %v1050_v26 = vsel %vm477_vm6, %v1040_v49, %v1041_v58  ;;  %v1074_v31 = vsel %vm532_vm7, %v1064_v2, %v1065_v27  ;;  %v2460_v49 = vmax.f32 %v1055_v29, %v1075_v43  ;;  %v2473_v56 = vsel %vm1094_vm8, %v1088_v17, %v1089_v19 }
 0x1eb   : > { %v1056_v13 = vmax.f32 %v2381_v30, %v1050_v26  ;;  %v1049_v60 = vsel %vm477_vm6, %v1041_v58, %v1042_v52  ;;  %v1058_v36 = vmax.f32 %v1034_v14, %v1048_v62  ;;  %v1073_v6 = vsel %vm532_vm7, %v1065_v27, %v1066_v61 }
 0x1ec   : > { %v1104_v30 = vmax.f32 %v2460_v49, %v2467_v54  ;;  %v1057_v4 = vmax.f32 %v2391_v39, %v1049_v60  ;;  %v1090_v2 = vrot.slane %v1034_v14, 3  ;;  %v1044_v58 = vrot.slane %v1036_v11, 1 }
 0x1ed   : > { %v2462_v50 = vmax.f32 %v1056_v13, %v1074_v31  ;;  %v1068_v13 = vrot.slane %v1036_v11, 2  ;;  %v1092_v31 = vrot.slane %v1036_v11, 3 }
 0x1ee   : > { %v2487_v15 = vmax.f32 %v1057_v4, %v1073_v6  ;;  %v2493_v26 = vsel %vm1094_vm8, %v1089_v19, %v1090_v2  ;;  %v2497_v39 = vsel %vm1094_vm8, %v1090_v2, %v1091_v18  ;;  %v1047_v29 = vsel %vm477_vm6, %v1043_v44, %v1044_v58  ;;  %v2527_v44 = vld [vmem:[%s2722_s3 + $0x8] sm:$0x1]  ;;  %v263_v6 = vld [vmem:[%s2722_s3 + $0x58] sm:$0xff] }
 0x1ef   : > { %v1105_v59 = vmax.f32 %v2462_v50, %v2473_v56  ;;  %v1071_v17 = vsel %vm532_vm7, %v1067_v38, %v1068_v13  ;;  %851 = vperm.xlu1 %1958, %v2527_v44   ;;  %v261_v4 = vld [vmem:[%s2722_s3 + $0x48] sm:$0xff]  ;;  %1268 = vrot.lane.b32.xlu0 %v2527_v44, %s2069_s6  ;;  %v1660_v56 = vld [vmem:[%s2722_s3 + $0x5] ss:$0 sm:$0xff] }
 0x1f0   : > { %v1106_v14 = vmax.f32 %v2487_v15, %v2493_v26 }
 0x2ae   : > { %v751_v28 = vpop.f32.mrb[8].mxu1 }
 0x2af   : > { %v752_v35 = vadd.f32 %v1641_v12, %v751_v28  ;;  %v753_v37 = vpop.f32.mrb[9].mxu1  ;;  %v1072_v12 = vsel %vm532_vm7, %v1066_v61, %v1067_v38  ;;  %v260_v38 = vld [vmem:[%s2722_s3 + $0x40] sm:$0xff] }
 0x2b0   : > { %v754_v32 = vpop.f32.mrb[10].mxu1  ;;  %v2489_v21 = vmax.f32 %v1058_v36, %v1072_v12  ;;  %v1059_v37 = vmax.f32 %v1035_v42, %v1047_v29  ;;  %v262_v36 = vld [vmem:[%s2722_s3 + $0x50] sm:$0xff]  ;;  %v1872_v2 = vpack.c.bf16 %v261_v4, %v260_v38  ;;  %v265_v29 = vld [vmem:[%s2722_s3 + $0x68] sm:$0xff]  ;;  %v1674_v4 = vld [vmem:[%s2722_s3 + $0x6] ss:$0 sm:$0xff] }
 0x2b1   : > { %1980 = vtanh.f32 %v752_v35  ;;  %v755_v51 = vpop.f32.mrb[11].mxu1  ;;  %v1046_v35 = vsel %vm477_vm6, %v1044_v58, %v1045_v41  ;;  %v1070_v32 = vsel %vm532_vm7, %v1068_v13, %v1069_v55  ;;  %v1095_v41 = vsel %vm1094_vm8, %v1092_v31, %v1093_v63 }
 0x2b2   : > { %v1107_v27 = vmax.f32 %v2489_v21, %v2497_v39  ;;  %v1060_v43 = vmax.f32 %v1036_v11, %v1046_v35  ;;  %v1083_v47 = vmax.f32 %v1059_v37, %v1071_v17  ;;  %v1096_v51 = vsel %vm1094_vm8, %v1091_v18, %v1092_v31  ;;  %v1646_v11 = vld [vmem:[%s2722_s3 + $0x1] ss:$0 sm:$0xff] }
 0x2b3   : > { %v485_v55 = vsel %vm477_vm6, %v466_v1, %v467_v45  ;;  %v540_v63 = vsel %vm532_vm7, %v523_v40, %v524_v57  ;;  %v247_v57 = vld [vmem:[%s2722_s3 + $0x2] sm:$0x1]  ;;  %v1868_v40 = vpack.c.bf16 %v259_v48, %v258_v23  ;;  %v1875_v18 = vpack.c.bf16 %v263_v6, %v262_v36  ;;  %v270_v23 = vld [vmem:[%s2722_s3 + $0x90] sm:$0xf] }
 0x2b4   : > { %v1084_v19 = vmax.f32 %v1060_v43, %v1070_v32  ;;  %v1108_v42 = vmax.f32 %v1083_v47, %v1096_v51  ;;  %v487_v33 = vadd.f32 %v485_v55, %v2233_v34  ;;  %v1269_v55 = vpop.permute.xlu0 %1268  ;;  %v268_v48 = vld [vmem:[%s2722_s3 + $0x80] sm:$0xff] }
 0x2b5   : > { %1908 = vpush %v1269_v55 }
 0x2b6   : > { %v1109_v52 = vmax.f32 %v1084_v19, %v1095_v41  ;;  %v542_v60 = vadd.f32 %v540_v63, %v487_v33 }
 0x2b8   : > { %v935_v45 = vadd.f32 %v2368_v16, %v542_v60 }
 0x2ba   : > { %v937_v34 = vsel %vm936_vm9, %v935_v45, -inf }
 0x2bb   : > { %v1981_v28 = vpop.eup %1980  ;;  %v938_v1 = vrot.slane %v937_v34, 4 }
 0x2bc   : > { %1786 = vmatmul.mubr.msk.f32.vlgmr.msra.gmra.mrb[12].mxu1 %vm762_vm4, %v1981_v28  ;;  %v264_v28 = vld [vmem:[%s2722_s3 + $0x60] sm:$0xff] }
 0x2bd   : > { %1790 = vmatprep.mubr.msk.f32.mxu1 %vm2063_vm0, %v2062_v0  ;;  %v939_v16 = vmax.f32 %v937_v34, %v938_v1  ;;  %v1881_v35 = vpack.c.bf16 %v265_v29, %v264_v28 }
 0x2bf   : > { %v940_v62 = vrot.slane %v939_v16, 2 }
 0x2c1   : > { %v941_v12 = vmax.f32 %v939_v16, %v940_v62 }
 0x2c3   : > { %v942_v58 = vrot.slane %v941_v12, 1 }
 0x2c5   : > { %v943_v13 = vmax.f32 %v941_v12, %v942_v58  ;;  %v252_v12 = vld [vmem:[%s2722_s3 + $0x7] sm:$0x1] }
 0x2e6   : > { %s1909_s30 = spop %1908 }
 0x38f   : > { %v844_v24 = vpop.f32.mrb[12].mxu1 }
 0x390   : > { %v845_v61 = vadd.f32 %v1646_v11, %v844_v24  ;;  %v1787_v22 = vpop.f32.mrb[13].mxu1 }
 0x392   : > { %1982 = vtanh.f32 %v845_v61 }
 0x39c   : > { %v1983_v25 = vpop.eup %1982 }
 0x39d   : > { %1789 = vmatpush3.xpose.msk.msra.mxu1 %vm762_vm4, %v1983_v25 }
 0x39e   : > { %1867 = vmatprep.subr.bf16.mxu1 %v2067_v46 }
 0x3a0   : > { %1791 = vmatmul.mubr.msk.f32.vlgmr.msra.gmra.mrb[14].mxu1 %vm762_vm4, %v247_v57  ;;  %v1271_v57 = vstv %s1909_s30 }
 0x3a1   : > { %1870 = vmatpush3.bf16.xpose.msk.msra.mxu1 %vm2291_vm5, %v1868_v40  ;;  %1801 = vmatprep.mubr.msk.f32.mxu1 %vm2063_vm0, %v2062_v0 }
 0x3a2   : > { %1871 = vmatprep.subr.bf16.mxu1 %v2067_v46 }
 0x3a9   : > { %1874 = vmatpush3.bf16.xpose.msk.msra.mxu1 %vm2291_vm5, %v1872_v2 }
 0x3aa   : > { %1877 = vmatprep.subr.msk.bf16.mxu1 %vm2291_vm5, %v1875_v18 }
 0x3b0   : > { %1802 = vmatmul.mubr.msk.f32.vlgmr.msra.gmra.mrb[16].mxu1 %vm762_vm4, %v943_v13 }
 0x3b1   : > { %1880 = vmatpush3.bf16.xpose.msk.msra.mxu1 %vm2291_vm5, %v1875_v18  ;;  %1812 = vmatprep.mubr.msk.f32.mxu1 %vm762_vm4, %v1103_v8  ;;  %v1900_v8 = vpack.c.bf16 %v267_v5, %v266_v3  ;;  %v852_v18 = vpop.permute.xlu1 %851 }
 0x3b2   : > { %1883 = vmatprep.subr.msk.bf16.mxu1 %vm2291_vm5, %v1881_v35 }
 0x3b9   : > { %1886 = vmatpush3.bf16.xpose.msk.msra.mxu1 %vm2291_vm5, %v1881_v35 }
 0x3ba   : > { %1899 = vmatprep.subr.bf16.mxu1 %v2067_v46 }
 0x3c0   : > { %1813 = vmatmul.mubr.msk.f32.vlgmr.msra.gmra.mrb[18].mxu1 %vm762_vm4, %v1104_v30 }
 0x3c1   : > { %1815 = vmatprep.mubr.msk.f32.mxu1 %vm762_vm4, %v1105_v59  ;;  %1902 = vmatpush3.bf16.xpose.msk.msra.mxu1 %vm2291_vm5, %v1900_v8 }
 0x3c2   : > { %1903 = vmatprep.subr.bf16.mxu1 %v2067_v46 }
 0x3c4   : > { %1816 = vmatmul.mubr.msk.f32.gmra.mrb[20].mxu1 %vm762_vm4, %v1106_v14 }
 0x3c5   : > { %1818 = vmatprep.mubr.msk.f32.mxu1 %vm762_vm4, %v1107_v27 }
 0x3c8   : > { %1819 = vmatmul.mubr.msk.f32.gmra.mrb[22].mxu1 %vm762_vm4, %v1108_v42 }
 0x3c9   : > { %1821 = vmatprep.mubr.msk.f32.mxu1 %vm762_vm4, %v1109_v52 }
 0x3cc   : > { %1822 = vmatmul.mubr.msk.f32.gmra.mrb[24].mxu1 %vm762_vm4, %v1110_v20  ;;  %v249_v20 = vld [vmem:[%s2722_s3 + $0x4] sm:$0x1] }
 0x3cd   : > { %1851 = vmatprep.mubr.msk.f32.mxu1 %vm2063_vm0, %v2062_v0 }
 0x473   : > { %v2632_v7 = vpop.f32.mrb[14].mxu1 }
 0x474   : > { %v1792_v9 = vpop.f32.mrb[15].mxu1 }
 0x483   : > { %v1025_v49 = vpop.f32.mrb[16].mxu1 }
 0x484   : > { %v1026_v50 = vadd.f32 %v1025_v49, %v249_v20  ;;  %v1803_v54 = vpop.f32.mrb[17].mxu1 }
 0x486   : > { %1984 = vtanh.f32 %v1026_v50 }
 0x490   : > { %v1985_v30 = vpop.eup %1984 }
 0x491   : > { %v1259_v15 = vrot.slane %v1985_v30, %v2274_v53 }
 0x493   : > { %v1814_v59 = vpop.f32.mrb[18].mxu1 }
 0x494   : > { %v1223_v21 = vadd.f32 %v1814_v59, %v1660_v56  ;;  %v1217_v26 = vpop.f32.mrb[19].mxu1 }
 0x495   : > { %v1218_v39 = vadd.f32 %v1660_v56, %v1217_v26 }
 0x496   : > { %v1261_v14 = vmul.f32 %v1259_v15, %v1223_v21 }
 0x497   : > { %v1260_v27 = vmul.f32 %v1259_v15, %v1218_v39  ;;  %v1817_v37 = vpop.f32.mrb[20].mxu1 }
 0x498   : > { %v1233_v43 = vadd.f32 %v1817_v37, %v1660_v56  ;;  %v1227_v17 = vpop.f32.mrb[21].mxu1 }
 0x499   : > { %v1888_v31 = vpack.c.bf16 %v1261_v14, %v1260_v27  ;;  %v1228_v32 = vadd.f32 %v1660_v56, %v1227_v17 }
 0x49a   : > { %v1263_v47 = vmul.f32 %v1259_v15, %v1233_v43 }
 0x49b   : > { %v1262_v19 = vmul.f32 %v1259_v15, %v1228_v32  ;;  %v1820_v51 = vpop.f32.mrb[22].mxu1  ;;  %1889 = vmatpush3.bf16.msra.mxu0 %v1888_v31 }
 0x49c   : > { %v1243_v41 = vadd.f32 %v1820_v51, %v1660_v56  ;;  %v1237_v42 = vpop.f32.mrb[23].mxu1  ;;  %1890 = vmatprep.subr.bf16.mxu0 %v2067_v46 }
 0x49d   : > { %v1891_v52 = vpack.c.bf16 %v1263_v47, %v1262_v19  ;;  %v1238_v53 = vadd.f32 %v1660_v56, %v1237_v42 }
 0x49e   : > { %v1265_v33 = vmul.f32 %v1259_v15, %v1243_v41 }
 0x49f   : > { %v1264_v63 = vmul.f32 %v1259_v15, %v1238_v53  ;;  %v1823_v11 = vpop.f32.mrb[24].mxu1  ;;  %1892 = vmatpush3.bf16.msra.mxu0 %v1891_v52 }
 0x4a0   : > { %v1253_v60 = vadd.f32 %v1823_v11, %v1660_v56  ;;  %v1247_v24 = vpop.f32.mrb[25].mxu1  ;;  %1893 = vmatprep.subr.bf16.mxu0 %v2067_v46 }
 0x4a1   : > { %v1894_v61 = vpack.c.bf16 %v1265_v33, %v1264_v63  ;;  %v1248_v22 = vadd.f32 %v1660_v56, %v1247_v24 }
 0x4a2   : > { %v1267_v45 = vmul.f32 %v1259_v15, %v1253_v60 }
 0x4a3   : > { %v1266_v34 = vmul.f32 %v1259_v15, %v1248_v22  ;;  %1895 = vmatpush3.bf16.msra.mxu0 %v1894_v61 }
 0x4a4   : > { %1896 = vmatprep.subr.bf16.mxu0 %v2067_v46  ;;  %v269_v46 = vld [vmem:[%s2722_s3 + $0x88] sm:$0xff] }
 0x4a5   : > { %v1897_v1 = vpack.c.bf16 %v1267_v45, %v1266_v34  ;;  %v1904_v25 = vpack.c.bf16 %v269_v46, %v268_v48 }
 0x4a7   : > { %1898 = vmatpush3.bf16.msra.mxu0 %v1897_v1  ;;  %1906 = vmatpush3.bf16.xpose.msk.msra.mxu1 %vm2291_vm5, %v1904_v25 }
 0x4a8   : > { %1854 = vmatprep.subr.mxu0 %v2062_v0 }
 0x4aa   : > { %1841 = vmatmul.mubr.msk.f32.vlgmr.msra.gmra.mrb[20].mxu0 %vm1273_vm10, %v270_v23 }
 0x4ab   : > { %1856 = vmatprep.mubr.msk.f32.mxu0 %vm2063_vm0, %v2062_v0  ;;  %v2070_v0 = vmov 2  }
 0x4ac   : > { %1959 = vset.pattern.permute.xlu0 %v2070_v0 }
 0x4ad   : > { %1439 = vperm.xlu0 %1959, %v2527_v44   ;;  %v927_v44 = vadd.f32 %v2632_v7, %v852_v18 }
 0x52c   : > { %v1440_v58 = vpop.permute.xlu0 %1439 }
 0x57d   : > { %v1343_v40 = vpop.f32.mrb[20].mxu0 }
 0x57e   : > { %v1344_v16 = vadd.f32 %v1343_v40, %v1271_v57  ;;  %v1842_v62 = vpop.f32.mrb[21].mxu0 }
 0x580   : > { %1986 = vtanh.f32 %v1344_v16 }
 0x58a   : > { %v1987_v38 = vpop.eup %1986 }
 0x58b   : > { %1852 = vmatmul.mubr.msk.f32.vlgmr.msra.gmra.mrb[26].mxu1 %vm762_vm4, %v1987_v38 }
 0x65e   : > { %v1433_v36 = vpop.f32.mrb[26].mxu1 }
 0x65f   : > { %v1434_v10 = vadd.f32 %v1674_v4, %v1433_v36  ;;  %v1853_v6 = vpop.f32.mrb[27].mxu1 }
 0x661   : > { %1988 = vtanh.f32 %v1434_v10 }
 0x662   : > { %1990 = vtanh.f32 %v927_v44 }
 0x66b   : > { %v1989_v2 = vpop.eup %1988 }
 0x66c   : > { %1855 = vmatpush3.xpose.msk.msra.mxu0 %vm762_vm4, %v1989_v2  ;;  %v1991_v35 = vpop.eup %1990 }
 0x66f   : > { %1857 = vmatmul.mubr.msk.f32.vlgmr.msra.gmra.mrb[22].mxu0 %vm762_vm4, %v252_v12 }
 0x742   : > { %v1514_v28 = vpop.f32.mrb[22].mxu0 }
 0x743   : > { %v1515_v29 = vadd.f32 %v1514_v28, %v1440_v58  ;;  %v1858_v13 = vpop.f32.mrb[23].mxu0 }
 0x745   : > { %1992 = vtanh.f32 %v1515_v29 }
 0x74f   : > { %v1993_v3 = vpop.eup %1992 }
 0x750   : > { %v1519_v5 = vadd.f32 %v1993_v3, %v1991_v35 }
 0x752   : > { %v1521_v8 = vsel %vm1520_vm11, %v1519_v5, -inf }
 0x753   : > { %1522 = vmax.xlane.f32.xlu1 %v1521_v8 }
 0x7e0   : > { %v1523_v9 = vpop.xlane.xlu1 %1522 }
 0x7e1   : > { %v1524_v20 = vsub.f32 %v1519_v5, %v1523_v9 }
 0x7e3   : > { %v1525_v49 = vmul.f32 1.442695, %v1524_v20 }
 0x7e5   : > { %1994 = vpow2.f32 %v1525_v49 }
 0x7ef   : > { %v1995_v7 = vpop.eup %1994 }
 0x7f0   : > { %v1527_v50 = vsel %vm1520_vm11, %v1995_v7, 0.0 }
 0x7f1   : > { %1528 = vadd.xlane.f32.xlu0 %v1527_v50 }
 0x87e   : > { %v1529_v54 = vpop.xlane.xlu0 %1528 }
 0x87f   : > { %1996 = vlog2.f32 %v1529_v54 }
 0x889   : > { %v1997_v30 = vpop.eup %1996 }
 0x88a   : > { %v1531_v56 = vmul.f32 0.6931472, %v1997_v30 }
 0x88c   : > { %v1532_v59 = vsub.f32 %v1524_v20, %v1531_v56 }
 0x88e   : > { %1533 = vst.msk [vmem:[%s204_s11] sm:$0x1] %vm1520_vm11, %v1532_v59 }
 0x88f   : > { %2011 = shalt.err (!%p2008_p3)
}
 0x890   : > { %s2012_s29 = scalar_lea.hbm %s2676_s20, 16  ;;  %s2016_s6 = scalar_lea.hbm %s2723_s4, 32 }
 0x891   : > { %p2013_p4 = scmp.ne.s32.totalorder %s2676_s20, %s2012_s29  ;;  %p2017_p9 = scmp.lt.u32.totalorder %s2676_s20, %s2723_s4 }
 0x892   : > { %p2018_p10 = scmp.lt.u32.totalorder %s2016_s6, %s2012_s29  ;;  %p2020_p12 = scmp.lt.u32.totalorder %s2012_s29, %s2676_s20 }
 0x893   : > { %p2014_p7 = pnand %p2013_p4, %p2135_p5 }
 0x894   : > { %p2019_p11 = por %p2018_p10, %p2017_p9 }
 0x895   : > { %p2015_p8 = pneg %p2014_p7 }
 0x896   : > { %p2021_p13 = por %p2020_p12, %p2019_p11 }
 0x898   : > { %p2022_p0 = pnand %p2021_p13, %p2015_p8 }
 0x89a   : > { %2025 = shalt.err (!%p2022_p0)
}
 0x89b   : > { %1910 = dma.vmem_to_hbm [thread:$0]  (%p2135_p5), %s2678_s12, 16, %s2676_s20, %s1535_s22  }
 0x89c PF: > { %p1916_p1 = scmp.ge.s32.totalorder %s2060_s18, 2  ;;  %s1559_s9 = sand.u32 1, %s2048_s15  }
 0x89d   : > { %s1560_s10 = scalar_lea.sflag [#allocation3], %s1559_s9 }
 0x89e   : > { %p1913_p2 = pnand %p1916_p1, %p2139_p6 }
 0x8a0   : > { %2043 = dma.done.wait (!%p1913_p2), %s1560_s10, 16  }
 0x8a1   : > { %2045 = vsyncadd (!%p1913_p2), %s1560_s10, 4294967280  ;;  %p14_p3 = scmp.ge.s32.totalorder %s2122_s21, 4   ;;  %s2728_s15 = smov %s2052_s16 }
 0x8a2   : > { %s2729_s16 = smov %s2056_s17  ;;  %s2730_s17 = smov %s2133_s24 }
 0x8a3   : > { %s2731_s18 = smov %s2122_s21  ;;  %16 = sbr.rel (!%p14_p3) target bundleno = 3 (0x3), region = 74 }
 0x8aa   :  { %1564 = vsyncpa [#allocation3], 1 }
 0x8ab   :  { %1566 = vsyncpa [#allocation3 + $0x1], 1 }

</bundles_post_ra>
